<compile_context>
chip_gen: v6e
topology: v6e:2x2x1
jax: 0.10.0
libtpu: 0.0.40
codegen_flags: <defaults>
</compile_context>

<pallas_src>
import functools
import math

import jax
import jax.numpy as jnp
from jax.experimental import pallas as pl
from jax.experimental.pallas import tpu as pltpu

_STATS_LANES = 128       # lane-dense stats block: lane0=cl, lane1=ma, lane2=va
_LANE = 128
_MXU_REDUCE_MIN_H = 512  # below this, gate/signature reductions stay on the VPU


def _round_up(x, m):
    return (x + m - 1) // m * m


@functools.lru_cache(maxsize=1)
def _vmem_capacity_bytes():
    """Physical VMEM per TensorCore (generation-aware); conservative fallback."""
    try:
        cap = getattr(pltpu.get_tpu_info(), "vmem_capacity_bytes", None)
        if cap:
            return int(cap)
    except Exception:
        pass
    return 64 * 2**20  # assume v7x-class (smallest VMEM) if the query fails


def _choose_batch_tile(B, vmem_cap):
    """Pick batch-tile size and padded batch while minimizing padding waste."""
    small_vmem = vmem_cap <= 64 * 2**20          # v7x-class part (2 TCs, 64 MiB)
    target = 256 if small_vmem else 512          # 128-MiB parts take bigger tiles
    n = max(1, -(-B // target))
    if small_vmem and B >= 512:
        n = max(n, 2)                            # >=2 blocks so both v7x TCs work
    tm = -(-B // n)
    if n == 1 and B % 8 == 0:
        return B, B                              # block == full array, no padding
    tm = _round_up(tm, 16)                       # bf16 output packs 2 rows/sublane
    return tm, n * tm


def _vertex_kernel(x_ref, wt_ref, bt_ref, w2_ref, bg_ref, t_ref, stats_ref, *,
                   mxu_reduce):
    # Per-tile cast of x to bf16 (hidden under the MXU), bf16 matmul, f32 acc.
    x = x_ref[...].astype(jnp.bfloat16)
    z = jnp.dot(x, wt_ref[...], preferred_element_type=jnp.float32)
    t = jnp.tanh(z + bt_ref[...])                    # (tm, H) f32
    t_ref[...] = t.astype(t_ref.dtype)               # bf16 writeback (half bytes)

    bg = bg_ref[0]                                    # scalar gate bias from SMEM
    if mxu_reduce:
        # w2: (H, 2) f32, col 0 = gate weight, col 1 = mystical signature.
        # f32 operands keep PyTorch parity on the H-long reductions; the N=2
        # matmul is negligible next to the main (H,H) one.
        g = jnp.dot(t, w2_ref[...], preferred_element_type=jnp.float32)   # (tm, 2)
        g0, g1 = g[:, 0:1], g[:, 1:2]
    else:
        # Small H: VPU multiply + lane reduce instead of extra MXU passes.
        g0 = jnp.sum(t * w2_ref[0:1, :], axis=-1, keepdims=True)
        g1 = jnp.sum(t * w2_ref[1:2, :], axis=-1, keepdims=True)

    cl = jax.nn.sigmoid(g0 + bg)                      # consciousness_level
    ma = jnp.tanh(g1)                                 # mystical_activation
    va = cl * (1.0 + 0.5 * ma)                        # vertex_activation

    # One lane-dense store instead of three lane-width-1 masked stores.
    lane = jax.lax.broadcasted_iota(jnp.int32, stats_ref.shape, 1)
    stats = jnp.where(lane == 0, cl,
                      jnp.where(lane == 1, ma,
                                jnp.where(lane == 2, va, 0.0)))
    stats_ref[...] = stats.astype(stats_ref.dtype)


@jax.jit
def hypercube_vertex_forward(x, w_t_bf16, b_t, w_g, b_g, signature):
    """x: (B, H) f32. w_t_bf16: (H_in, H_out) pre-transposed bf16 weight of
    vertex_transform. b_t/w_g/signature: (H,) f32. b_g: scalar f32."""
    B, H = x.shape
    vmem_cap = _vmem_capacity_bytes()
    tm, B_pad = _choose_batch_tile(B, vmem_cap)
    grid = (B_pad // tm,)
    mxu_reduce = H >= _MXU_REDUCE_MIN_H

    # x stays f32 in HBM (no wrapper-side bf16 materialization); pad only when
    # the tiling actually requires it.
    x_p = jnp.pad(x, ((0, B_pad - B), (0, 0))) if B_pad != B else x

    if mxu_reduce:
        w2 = jnp.stack([w_g, signature], axis=1).astype(jnp.float32)    # (H, 2)
        w2_spec = pl.BlockSpec((H, 2), lambda i: (0, 0),
                               pipeline_mode=pl.Buffered(1))
        w2_bytes = _round_up(H, 8) * _LANE * 4        # lane-padded to 128
    else:
        w2 = jnp.stack([w_g, signature], axis=0).astype(jnp.float32)    # (2, H)
        w2_spec = pl.BlockSpec((2, H), lambda i: (0, 0),
                               pipeline_mode=pl.Buffered(1))
        w2_bytes = 8 * _round_up(H, _LANE) * 4        # sublane-padded to 8

    # Honest per-buffer VMEM accounting: only the batch-tiled blocks are
    # double-buffered; the constant (revisiting) blocks are single-buffered.
    h_lanes = _round_up(H, _LANE)
    pipelined = 2 * (tm * h_lanes * 4                 # x in  (f32)
                     + tm * h_lanes * 2               # t out (bf16)
                     + tm * _STATS_LANES * 4)         # stats out (f32)
    resident = (_round_up(H, 16) * h_lanes * 2        # w_t (bf16, Buffered(1))
                + 8 * h_lanes * 4                     # b_t
                + w2_bytes)
    est = pipelined + resident
    vmem_limit = min(int(0.9 * vmem_cap), max(32 << 20, est + (2 << 20)))
    # TODO(synk): if `est` exceeds ~0.9*vmem_cap (H >~ 4096 on v7x even with a
    # single-buffered bf16 weight), add K/N grid axes for w_t with an f32
    # accumulator scratch instead of keeping the full weight resident.

    kernel = functools.partial(_vertex_kernel, mxu_reduce=mxu_reduce)
    t_pad, stats = pl.pallas_call(
        kernel,
        out_shape=(
            jax.ShapeDtypeStruct((B_pad, H), jnp.bfloat16),             # transformed
            jax.ShapeDtypeStruct((B_pad, _STATS_LANES), jnp.float32),   # cl|ma|va
        ),
        grid=grid,
        in_specs=[
            pl.BlockSpec((tm, H), lambda i: (i, 0)),                               # x
            pl.BlockSpec((H, H), lambda i: (0, 0), pipeline_mode=pl.Buffered(1)),  # w_t
            pl.BlockSpec((1, H), lambda i: (0, 0), pipeline_mode=pl.Buffered(1)),  # b_t
            w2_spec,                                                               # [w_g | sig]
            pl.BlockSpec(memory_space=pltpu.MemorySpace.SMEM),                     # b_g
        ],
        out_specs=(
            pl.BlockSpec((tm, H), lambda i: (i, 0)),
            pl.BlockSpec((tm, _STATS_LANES), lambda i: (i, 0)),
        ),
        compiler_params=pltpu.CompilerParams(
            dimension_semantics=("parallel",),
            vmem_limit_bytes=int(vmem_limit),
        ),
    )(
        x_p,
        w_t_bf16,
        b_t.reshape(1, H).astype(jnp.float32),
        w2,
        jnp.reshape(b_g, (1,)).astype(jnp.float32),
    )

    return {
        "transformed": t_pad[:B],                      # bf16 (halved writeback)
        "consciousness_level": stats[:B, 0:1],
        "mystical_activation": stats[:B, 1:2],
        "vertex_activation": stats[:B, 2:3],
        # signature expand is pure broadcast glue — done outside the kernel.
        "signature": jnp.broadcast_to(signature[None, :], (B, H)),
    }


def init_vertex_params(key, hidden_dim, vertex_index):
    """Deterministic parameter init mirroring HypercubeVertex.__init__."""
    k1, k2, k3, k4, k5 = jax.random.split(key, 5)
    coordinates = [int(b) for b in format(vertex_index, "05b")]
    consciousness_strength = sum(coordinates) / 5.0

    bound = 1.0 / math.sqrt(hidden_dim)
    w_t = jax.random.uniform(k1, (hidden_dim, hidden_dim), jnp.float32, -bound, bound)
    b_t = jax.random.uniform(k2, (hidden_dim,), jnp.float32, -bound, bound)
    w_g = jax.random.uniform(k3, (hidden_dim,), jnp.float32, -bound, bound)
    b_g = jax.random.uniform(k4, (), jnp.float32, -bound, bound)
    signature = jax.random.normal(k5, (hidden_dim,), jnp.float32) * 0.01

    # _initialize_vertex_properties
    w_t = w_t * (0.5 + consciousness_strength)
    signature = signature * consciousness_strength
    if vertex_index == 0:
        signature = jnp.zeros_like(signature)
    elif vertex_index == 31:
        signature = signature * 2.0

    # store vertex_transform weight pre-transposed: (H_in, H_out)
    return dict(w_t=w_t.T, b_t=b_t, w_g=w_g, b_g=b_g, signature=signature)


def _reference_f32(x, p):
    """Pure-f32 JAX equivalent of HypercubeVertex.forward."""
    t = jnp.tanh(x @ p["w_t"] + p["b_t"])
    cl = jax.nn.sigmoid(t @ p["w_g"][:, None] + p["b_g"])
    si = jnp.sum(t * p["signature"][None, :], axis=-1, keepdims=True)
    ma = jnp.tanh(si)
    va = cl * (1.0 + 0.5 * ma)
    return t, cl, ma, va


def _check_case(B, H, vertex_index, key, atol):
    kx, kp = jax.random.split(key)
    x = jax.random.normal(kx, (B, H), jnp.float32)
    p = init_vertex_params(kp, H, vertex_index)
    w_t_bf16 = p["w_t"].astype(jnp.bfloat16)

    out = hypercube_vertex_forward(x, w_t_bf16, p["b_t"], p["w_g"],
                                   p["b_g"], p["signature"])
    out = jax.block_until_ready(out)

    t_r, cl_r, ma_r, va_r = _reference_f32(x, p)
    assert out["transformed"].shape == (B, H)
    assert jnp.allclose(out["transformed"].astype(jnp.float32), t_r, atol=atol), "transformed"
    assert jnp.allclose(out["consciousness_level"], cl_r, atol=atol), "consciousness_level"
    assert jnp.allclose(out["mystical_activation"], ma_r, atol=atol), "mystical_activation"
    assert jnp.allclose(out["vertex_activation"], va_r, atol=atol), "vertex_activation"
    assert out["signature"].shape == (B, H)
    assert jnp.allclose(out["signature"],
                        jnp.broadcast_to(p["signature"][None, :], (B, H))), "signature"


if __name__ == "__main__":
    key = jax.random.PRNGKey(0)
    k1, k2 = jax.random.split(key)
    # Small-H case: gate/signature reductions take the VPU path.
    _check_case(B=8, H=32, vertex_index=13, key=k1, atol=3e-2)
    # Larger-H case: reductions fused onto the MXU (still small & fast).
    _check_case(B=16, H=512, vertex_index=31, key=k2, atol=5e-2)
    print("KERNEL_OK")
</pallas_src>

<mosaic_0001>
module attributes {stable_mosaic.version = 11 : i64} {
  func.func @_vertex_kernel(%arg0: i32, %arg1: memref<8x32xf32, #tpu.memory_space<vmem>>, %arg2: memref<32x32xbf16, #tpu.memory_space<vmem>>, %arg3: memref<1x32xf32, #tpu.memory_space<vmem>>, %arg4: memref<2x32xf32, #tpu.memory_space<vmem>>, %arg5: memref<1xf32, #tpu.memory_space<smem>>, %arg6: memref<8x32xbf16, #tpu.memory_space<vmem>>, %arg7: memref<8x128xf32, #tpu.memory_space<vmem>>) attributes {dimension_semantics = [#tpu.dimension_semantics<parallel>], iteration_bounds = array<i64: 1>, scalar_prefetch = 0 : i64, scratch_operands = 0 : i64, tpu.core_type = #tpu.core_type<tc>, window_params = [{transform_indices = @transform_0, window_bounds = array<i64: 8, 32>}, {pipeline_mode = #tpu.pipeline_mode<synchronous>, transform_indices = @transform_1, window_bounds = array<i64: 32, 32>}, {pipeline_mode = #tpu.pipeline_mode<synchronous>, transform_indices = @transform_2, window_bounds = array<i64: 1, 32>}, {pipeline_mode = #tpu.pipeline_mode<synchronous>, transform_indices = @transform_3, window_bounds = array<i64: 2, 32>}, {transform_indices = @transform_4, window_bounds = array<i64: 1>}, {transform_indices = @transform_5, window_bounds = array<i64: 8, 32>}, {transform_indices = @transform_6, window_bounds = array<i64: 8, 128>}]} {
    %c0 = arith.constant 0 : index
    %c0_0 = arith.constant 0 : index
    %0 = vector.load %arg1[%c0, %c0_0] : memref<8x32xf32, #tpu.memory_space<vmem>>, vector<8x32xf32>
    %1 = arith.truncf %0 : vector<8x32xf32> to vector<8x32xbf16>
    %c0_1 = arith.constant 0 : index
    %c0_2 = arith.constant 0 : index
    %2 = vector.load %arg2[%c0_1, %c0_2] : memref<32x32xbf16, #tpu.memory_space<vmem>>, vector<32x32xbf16>
    %cst = arith.constant dense<0.000000e+00> : vector<8x32xf32>
    %3 = tpu.matmul %1, %2, %cst {dimension_numbers = #tpu.dot_dimension_numbers<[1], [0], [0], [1], [0, 0, 1, 1], [], []>} : vector<8x32xbf16>, vector<32x32xbf16>, vector<8x32xf32> -> vector<8x32xf32>
    %c0_3 = arith.constant 0 : index
    %c0_4 = arith.constant 0 : index
    %4 = vector.load %arg3[%c0_3, %c0_4] : memref<1x32xf32, #tpu.memory_space<vmem>>, vector<1x32xf32>
    %5 = vector.broadcast %4 : vector<1x32xf32> to vector<8x32xf32>
    %6 = arith.addf %3, %5 : vector<8x32xf32>
    %7 = math.tanh %6 : vector<8x32xf32>
    %8 = arith.truncf %7 : vector<8x32xf32> to vector<8x32xbf16>
    %c0_5 = arith.constant 0 : index
    %c0_6 = arith.constant 0 : index
    %9 = vector.load %arg6[%c0_5, %c0_6] : memref<8x32xbf16, #tpu.memory_space<vmem>>, vector<8x32xbf16>
    tpu.vector_store %arg6[%c0_5, %c0_6], %8 {strides = array<i32>} : memref<8x32xbf16, #tpu.memory_space<vmem>>, vector<8x32xbf16>,
    %c0_7 = arith.constant 0 : index
    %10 = memref.load %arg5[%c0_7] : memref<1xf32, #tpu.memory_space<smem>>
    %c0_8 = arith.constant 0 : index
    %c0_9 = arith.constant 0 : index
    %11 = vector.load %arg4[%c0_8, %c0_9] : memref<2x32xf32, #tpu.memory_space<vmem>>, vector<1x32xf32>
    %12 = vector.broadcast %11 : vector<1x32xf32> to vector<8x32xf32>
    %13 = arith.mulf %7, %12 : vector<8x32xf32>
    %cst_10 = arith.constant dense<0.000000e+00> : vector<8xf32>
    %14 = vector.multi_reduction <add>, %13, %cst_10 [1] : vector<8x32xf32> to vector<8xf32>
    %15 = vector.shape_cast %14 : vector<8xf32> to vector<8x1xf32>
    %c1 = arith.constant 1 : index
    %c0_11 = arith.constant 0 : index
    %16 = vector.load %arg4[%c1, %c0_11] : memref<2x32xf32, #tpu.memory_space<vmem>>, vector<1x32xf32>
    %17 = vector.broadcast %16 : vector<1x32xf32> to vector<8x32xf32>
    %18 = arith.mulf %7, %17 : vector<8x32xf32>
    %cst_12 = arith.constant dense<0.000000e+00> : vector<8xf32>
    %19 = vector.multi_reduction <add>, %18, %cst_12 [1] : vector<8x32xf32> to vector<8xf32>
    %20 = vector.shape_cast %19 : vector<8xf32> to vector<8x1xf32>
    %21 = vector.broadcast %10 : f32 to vector<8x1xf32>
    %22 = arith.addf %15, %21 : vector<8x1xf32>
    %23 = arith.negf %22 : vector<8x1xf32>
    %24 = math.exp %23 : vector<8x1xf32>
    %cst_13 = arith.constant 1.000000e+00 : f32
    %25 = vector.broadcast %cst_13 : f32 to vector<8x1xf32>
    %26 = arith.addf %25, %24 : vector<8x1xf32>
    %27 = arith.divf %25, %26 : vector<8x1xf32>
    %28 = math.tanh %20 : vector<8x1xf32>
    %cst_14 = arith.constant 5.000000e-01 : f32
    %29 = vector.broadcast %cst_14 : f32 to vector<8x1xf32>
    %30 = arith.mulf %29, %28 : vector<8x1xf32>
    %cst_15 = arith.constant 1.000000e+00 : f32
    %31 = vector.broadcast %cst_15 : f32 to vector<8x1xf32>
    %32 = arith.addf %31, %30 : vector<8x1xf32>
    %33 = arith.mulf %27, %32 : vector<8x1xf32>
    %34 = tpu.iota {dimensions = array<i32: 1>} : vector<8x128xi32>
    %c0_i32 = arith.constant 0 : i32
    %35 = vector.broadcast %c0_i32 : i32 to vector<8x128xi32>
    %36 = arith.cmpi eq, %34, %35 : vector<8x128xi32>
    %c1_i32 = arith.constant 1 : i32
    %37 = vector.broadcast %c1_i32 : i32 to vector<8x128xi32>
    %38 = arith.cmpi eq, %34, %37 : vector<8x128xi32>
    %c2_i32 = arith.constant 2 : i32
    %39 = vector.broadcast %c2_i32 : i32 to vector<8x128xi32>
    %40 = arith.cmpi eq, %34, %39 : vector<8x128xi32>
    %cst_16 = arith.constant 0.000000e+00 : f32
    %41 = vector.shape_cast %33 : vector<8x1xf32> to vector<8x1xf32>
    %42 = vector.broadcast %41 : vector<8x1xf32> to vector<8x128xf32>
    %43 = vector.broadcast %cst_16 : f32 to vector<8x128xf32>
    %44 = arith.select %40, %42, %43 : vector<8x128xi1>, vector<8x128xf32>
    %45 = vector.shape_cast %28 : vector<8x1xf32> to vector<8x1xf32>
    %46 = vector.broadcast %45 : vector<8x1xf32> to vector<8x128xf32>
    %47 = arith.select %38, %46, %44 : vector<8x128xi1>, vector<8x128xf32>
    %48 = vector.shape_cast %27 : vector<8x1xf32> to vector<8x1xf32>
    %49 = vector.broadcast %48 : vector<8x1xf32> to vector<8x128xf32>
    %50 = arith.select %36, %49, %47 : vector<8x128xi1>, vector<8x128xf32>
    %c0_17 = arith.constant 0 : index
    %c0_18 = arith.constant 0 : index
    %51 = vector.load %arg7[%c0_17, %c0_18] : memref<8x128xf32, #tpu.memory_space<vmem>>, vector<8x128xf32>
    tpu.vector_store %arg7[%c0_17, %c0_18], %50 {strides = array<i32>} : memref<8x128xf32, #tpu.memory_space<vmem>>, vector<8x128xf32>,
    return
  }
  func.func @transform_0(%arg0: i32) -> (i32, i32) {
    %c0_i32 = arith.constant 0 : i32
    %c0_i32_0 = arith.constant 0 : i32
    return %arg0, %c0_i32 : i32, i32
  }
  func.func @transform_1(%arg0: i32) -> (i32, i32) {
    %c0_i32 = arith.constant 0 : i32
    %c0_i32_0 = arith.constant 0 : i32
    %c0_i32_1 = arith.constant 0 : i32
    return %c0_i32, %c0_i32_0 : i32, i32
  }
  func.func @transform_2(%arg0: i32) -> (i32, i32) {
    %c0_i32 = arith.constant 0 : i32
    %c0_i32_0 = arith.constant 0 : i32
    %c0_i32_1 = arith.constant 0 : i32
    return %c0_i32, %c0_i32_0 : i32, i32
  }
  func.func @transform_3(%arg0: i32) -> (i32, i32) {
    %c0_i32 = arith.constant 0 : i32
    %c0_i32_0 = arith.constant 0 : i32
    %c0_i32_1 = arith.constant 0 : i32
    return %c0_i32, %c0_i32_0 : i32, i32
  }
  func.func @transform_4(%arg0: i32) -> i32 {
    %c0_i32 = arith.constant 0 : i32
    %c0_i32_0 = arith.constant 0 : i32
    return %c0_i32 : i32
  }
  func.func @transform_5(%arg0: i32) -> (i32, i32) {
    %c0_i32 = arith.constant 0 : i32
    %c0_i32_0 = arith.constant 0 : i32
    return %arg0, %c0_i32 : i32, i32
  }
  func.func @transform_6(%arg0: i32) -> (i32, i32) {
    %c0_i32 = arith.constant 0 : i32
    %c0_i32_0 = arith.constant 0 : i32
    return %arg0, %c0_i32 : i32, i32
  }
}

</mosaic_0001>

<bundles_post_ra>
// kernel: hypercube_vertex_forward.1
= control target key start
LH: loop header
LB: loop body
LE: loop exit
PB: predicated region body
PF: predicated region fallthrough
CT: control target
= control target key end

     0   :  { %13 = vsyncpa [#allocation4], 0  ;;  %s317_s0 = inlined_call_operand.vmem [shape: f32[8,32], index: 0, kind: input, shape index: {}]   ;;  %s318_s1 = inlined_call_operand.hbm [shape: bf16[32,32], index: 1, kind: input, shape index: {}]   ;;  %s319_s2 = inlined_call_operand.vmem [shape: f32[1,32], index: 2, kind: input, shape index: {}]   ;;  %s320_s3 = inlined_call_operand.vmem [shape: f32[2,32], index: 3, kind: input, shape index: {}]   ;;  %s321_s4 = inlined_call_operand.<no memory space> [shape: f32[1], index: 4, kind: input, shape index: {}]   ;;  %s322_s5 = inlined_call_operand.hbm [shape: bf16[8,32], index: 5, kind: output, shape index: {0}]   ;;  %s323_s6 = inlined_call_operand.vmem [shape: f32[8,128], index: 6, kind: output, shape index: {1}]  }
   0x1   :  { %14 = vsyncpa [#allocation5], 0  ;;  %s249_s21 = smov [#allocation3]  }
   0x2   :  { %s22_s22 = sshll.u32 %s249_s21, 4  ;;  %s23_s22 = int_to_ptr.vmem [resolvable:$true] %s22_s22 }
   0x3   :  { %s213_s23 = scalar_lea.vmem %s23_s22, 256  ;;  %p218_p1 = scmp.lt.s32.totalorder %s23_s22, %s23_s22 }
   0x4   :  { %p214_p0 = scmp.ne.s32.totalorder %s23_s22, %s213_s23  ;;  %p219_p2 = scmp.lt.s32.totalorder %s213_s23, %s213_s23 }
   0x6   :  { %p220_p3 = por %p219_p2, %p218_p1 }
   0x8   :  { %p221_p4 = pnand %p220_p3, %p214_p0 }
   0xa   :  { %224 = shalt.err (!%p221_p4)
}
   0xb   :  { %s250_s24 = smov 64   ;;  %s251_s25 = smov 4  }
   0xc   :  { %28 = dma.hbm_to_vmem [thread:$0]  %s318_s1, 256, %s23_s22, [#allocation4], %s250_s24, %s250_s24, %s251_s25  }
   0xd   :  { %245 = dma.done.wait [#allocation4], 256  }
   0xe   :  { %246 = vsyncadd [#allocation4], 4294967040  ;;  %v252_v0 = vmov 0.0   ;;  %vm253_vm0 = vmmov 0   ;;  %v195_v1 = vld [vmem:[#allocation3 + $0x8] sm:$0xff]   ;;  %v196_v2 = vld [vmem:[#allocation3] sm:$0xff]  }
   0xf   :  { %181 = vmatprep.subr.bf16.mxu0 %v252_v0  ;;  %185 = vmatprep.mubr.msk.bf16.mxu0 %vm253_vm0, %v252_v0  ;;  %v39_v3 = vld [vmem:[%s317_s0] sm:$0xff]  ;;  %vm64_vm1 = vcmask 261120   ;;  %vm110_vm2 = vcmask 257024  }
  0x10   :  { %182 = vmatpush3.bf16.msra.mxu0 %v195_v1  ;;  %v40_v4 = vpack.c.bf16 %v39_v3, %v39_v3  ;;  %v171_v5 = vld [vmem:[%s319_s2] ss:$0 sm:$0xff]  ;;  %v176_v13 = vld [vmem:[%s320_s3 + $0x1] ss:$0 sm:$0xff]  ;;  %s254_s2 = smov [#allocation6]  }
  0x11   :  { %183 = vmatprep.subr.bf16.mxu0 %v252_v0  ;;  %v175_v11 = vld [vmem:[%s320_s3] ss:$0 sm:$0xff]  ;;  %s158_s10 = sshll.u32 %s254_s2, 4  ;;  %s159_s10 = int_to_ptr.vmem [resolvable:$true] %s158_s10 }
  0x12   :  { %s225_s11 = scalar_lea.vmem %s159_s10, 64  ;;  %p230_p6 = scmp.lt.s32.totalorder %s159_s10, %s159_s10 }
  0x13   :  { %p226_p5 = scmp.ne.s32.totalorder %s159_s10, %s225_s11  ;;  %p231_p7 = scmp.lt.s32.totalorder %s225_s11, %s225_s11 }
  0x14   :  { %184 = vmatpush3.bf16.msra.mxu0 %v196_v2 }
  0x15   :  { %p232_p8 = por %p231_p7, %p230_p6 }
  0x17   :  { %186 = vmatmul.mubr.msk.bf16.vlgmr.msra.gmra.mxu0 %vm64_vm1, %v40_v4  ;;  %p233_p9 = pnand %p232_p8, %p226_p5 }
  0xd7   :  { %v102_v6 = vpop.f32.mrf.mxu0 }
  0xd8   :  { %v103_v7 = vadd.f32 %v171_v5, %v102_v6 }
  0xd9   :  { %v187_v8 = vpop.f32.mrf.mxu0 }
  0xda   :  { %197 = vtanh.f32 %v103_v7 }
  0xdb   :  { %v105_v9 = vpop.f32.mrf.mxu0 }
  0xdd   :  { %v188_v10 = vpop.f32.mrf.mxu0 }
  0xe7   :  { %v198_v12 = vpop.eup %197 }
  0xe8   :  { %v118_v14 = vmul.f32 %v198_v12, %v175_v11  ;;  %v109_v15 = vpack.c.bf16 %v198_v12, %v198_v12  ;;  %v127_v17 = vmul.f32 %v198_v12, %v176_v13 }
  0xea   :  { %v119_v16 = vsel %vm64_vm1, %v118_v14, 0.0  ;;  %111 = vst.msk [vmem:[#allocation6] sm:$0xf] %vm110_vm2, %v109_v15  ;;  %v128_v18 = vsel %vm64_vm1, %v127_v17, 0.0 }
  0xeb   :  { %120 = vadd.xlane.f32.xlu0 %v119_v16 }
  0xef   :  { %129 = vadd.xlane.f32.xlu0 %v128_v18 }
  0xf0   :  { %236 = shalt.err (!%p233_p9)
}
  0xf1   :  { %161 = dma.vmem_to_hbm [thread:$0]  %s159_s10, 64, %s322_s5, [#allocation5]   ;;  %v131_v19 = vstv %s321_s4  ;;  %v143_v27 = vlaneseq }
  0xf3   :  { %v144_v29 = vand.u32 127, %v143_v27 }
  0xf5   :  { %vm147_vm3 = vcmp.eq.s32.totalorder %v144_v29, 2  ;;  %vm146_vm4 = vcmp.eq.s32.totalorder %v144_v29, 1  ;;  %vm145_vm5 = vcmp.eq.s32.totalorder %v144_v29, 0 }
 0x174   :  { %v121_v20 = vpop.xlane.xlu0 %120 }
 0x175   :  { %v132_v21 = vadd.f32 %v131_v19, %v121_v20 }
 0x177   :  { %v177_v22 = vmul.f32 -1.442695, %v132_v21 }
 0x178   :  { %v130_v23 = vpop.xlane.xlu0 %129 }
 0x179   :  { %199 = vpow2.f32 %v177_v22 }
 0x17a   :  { %201 = vtanh.f32 %v130_v23 }
 0x186   :  { %v200_v24 = vpop.eup %199 }
 0x187   :  { %v136_v25 = vadd.f32 1.0, %v200_v24  ;;  %v202_v26 = vpop.eup %201 }
 0x188   :  { %v140_v28 = vmul.f32 0.5, %v202_v26 }
 0x189   :  { %203 = vrcp.f32 %v136_v25 }
 0x18a   :  { %v141_v30 = vadd.f32 1.0, %v140_v28 }
 0x196   :  { %v204_v31 = vpop.eup %203 }
 0x197   :  { %v142_v32 = vmul.f32 %v204_v31, %v141_v30 }
 0x199   :  { %v148_v33 = vsel %vm147_vm3, %v142_v32, 0.0 }
 0x19a   :  { %v149_v34 = vsel %vm146_vm4, %v202_v26, %v148_v33 }
 0x19b   :  { %v150_v35 = vsel %vm145_vm5, %v204_v31, %v149_v34 }
 0x19c   :  { %151 = vst [vmem:[%s323_s6] sm:$0xff] %v150_v35 }
 0x19d   :  { %247 = dma.done.wait [#allocation5], 64  }
 0x19e   :  { %248 = vsyncadd [#allocation5], 4294967232 }
 0x19f   :  { %169 = vsyncpa [#allocation4], 1 }
 0x1a0   :  { %170 = vsyncpa [#allocation5], 1 }

</bundles_post_ra>
